<compile_context>
chip_gen: v6e
topology: v6e:2x2x1
jax: 0.10.0
libtpu: 0.0.40
codegen_flags: <defaults>
</compile_context>

<pallas_src>
import functools

import jax
import jax.numpy as jnp
from jax.experimental import pallas as pl
from jax.experimental.pallas import tpu as pltpu

BN_EPS = 1e-5
LANE = 128
TN_MAX = 512          # max out-feature tile width (multiple of 128)


def _round_up(v, m):
    return ((v + m - 1) // m) * m


def _pick_tile(out_pad, tn_max=TN_MAX):
    """Largest multiple of 128 that divides out_pad and is <= tn_max."""
    tn = min(max(tn_max, LANE), out_pad)
    tn -= tn % LANE
    while out_pad % tn:
        tn -= LANE
    return tn


# --------------------------------------------------------------------------- #
# Fused kernel
# --------------------------------------------------------------------------- #
def _fused_fcs_kernel(*refs, plan, n_batch):
    """Entire FCsBlock forward in one kernel.

    refs = (x_ref,
            per layer: w_hbm_ref (+ gamma,beta | + bias),
            o_ref,
            wbuf, act_a, act_b, sem)

    `plan` is a static tuple of per-layer dicts:
      kind: "bn_relu" (Linear, bias cancelled by BN, + BN + ReLU)
            "bias_relu" (Linear + bias + ReLU; BN skipped, e.g. batch==1)
            "linear"    (final `out` Linear)
      k, out_pad, tn, n_tiles: static shape info.

    Weights live in HBM; each (layer, out-feature tile) slab is DMA'd into a
    double-buffered VMEM scratch so the next slab's HBM fetch overlaps the
    current tile's MXU work.  Activations never leave VMEM.
    """
    x_ref = refs[0]
    idx = 1
    layer_refs = []
    for L in plan:
        n_p = 3 if L["kind"] == "bn_relu" else 2
        layer_refs.append(refs[idx:idx + n_p])
        idx += n_p
    o_ref = refs[idx]
    wbuf, act_a, act_b, sem = refs[idx + 1: idx + 5]

    # Static DMA schedule: one item per (layer, out-feature tile).
    items = []
    for li, L in enumerate(plan):
        for t in range(L["n_tiles"]):
            items.append((li, t))

    def start_copy(i, slot):
        li, t = items[i]
        L = plan[li]
        cp = pltpu.make_async_copy(
            layer_refs[li][0].at[t],                        # (K, tn) slab in HBM
            wbuf.at[slot, :L["k"], :L["tn"]],
            sem.at[slot])
        cp.start()
        return cp

    copies = {0: start_copy(0, 0)}

    inv_n = 1.0 / float(n_batch)
    act_bufs = (act_a, act_b)
    buf_idx = 0
    h_cur = x_ref[...].astype(jnp.bfloat16)                 # layer-0 input (N, F)

    i = 0
    for li, L in enumerate(plan):
        kind, k, tn, out_pad = L["kind"], L["k"], L["tn"], L["out_pad"]
        prefs = layer_refs[li]
        is_last = li == len(plan) - 1
        dst = None if is_last else act_bufs[buf_idx]
        for t in range(L["n_tiles"]):
            slot = i % 2
            copies[i].wait()                                 # weight slab ready
            if i + 1 < len(items):                           # prefetch next slab
                copies[i + 1] = start_copy(i + 1, 1 - slot)

            w_tile = wbuf[slot, :k, :tn]                     # bf16 (K, tn)
            acc = jnp.dot(h_cur, w_tile, preferred_element_type=jnp.float32)
            cs, ce = t * tn, (t + 1) * tn

            if kind == "bn_relu":
                # Linear bias cancels exactly under BN's mean subtraction -> dropped.
                # Single-pass batch stats (f32, var clamped >= 0).
                # Padded lanes have gamma == 0 -> output exactly 0 there.
                gamma = prefs[1][:, cs:ce]
                beta = prefs[2][:, cs:ce]
                mean = jnp.sum(acc, axis=0, keepdims=True) * inv_n
                ex2 = jnp.sum(acc * acc, axis=0, keepdims=True) * inv_n
                var = jnp.maximum(ex2 - mean * mean, 0.0)
                scale = gamma * jax.lax.rsqrt(var + BN_EPS)
                shift = beta - mean * scale
                dst[:, cs:ce] = jnp.maximum(acc * scale + shift, 0.0
                                            ).astype(jnp.bfloat16)
            elif kind == "bias_relu":
                b = prefs[1][:, cs:ce]
                dst[:, cs:ce] = jnp.maximum(acc + b, 0.0).astype(jnp.bfloat16)
            else:  # "linear" -- final layer, lane-dense f32 stores
                b = prefs[1][:, cs:ce]
                o_ref[:, cs:ce] = (acc + b).astype(o_ref.dtype)
            i += 1
        if not is_last:
            h_cur = dst[:, :out_pad]                         # next layer's input (VMEM)
            buf_idx = 1 - buf_idx


# --------------------------------------------------------------------------- #
# Parameter init (PyTorch shapes) and one-time packing
# --------------------------------------------------------------------------- #
def init_fcs_block(key, n_features, fcs_hidden, n_classes, bias=True):
    """Deterministic synthetic parameters (PyTorch shapes: W is (out, in))."""
    dims = [n_features] + list(fcs_hidden)
    params = {"fcs": [], "out": None}
    for i in range(len(dims) - 1):
        key, kw, kb = jax.random.split(key, 3)
        w = jax.random.normal(kw, (dims[i + 1], dims[i]), jnp.float32) / jnp.sqrt(dims[i])
        b = (jax.random.normal(kb, (dims[i + 1],), jnp.float32) * 0.01
             if bias else jnp.zeros((dims[i + 1],), jnp.float32))
        params["fcs"].append({"w": w, "b": b,
                              "gamma": jnp.ones((dims[i + 1],), jnp.float32),
                              "beta": jnp.zeros((dims[i + 1],), jnp.float32)})
    key, kw, kb = jax.random.split(key, 3)
    w = jax.random.normal(kw, (n_classes, dims[-1]), jnp.float32) / jnp.sqrt(dims[-1])
    b = (jax.random.normal(kb, (n_classes,), jnp.float32) * 0.01
         if bias else jnp.zeros((n_classes,), jnp.float32))
    params["out"] = {"w": w, "b": b}
    return params


def pack_fcs_block(params, tn_max=TN_MAX):
    """One-time packing:
       W -> (n_tiles, K, tn) bf16 DMA slabs (K = raw n_features for layer 0,
       previous layer's padded width otherwise; output features padded to 128
       and tiled by tn).  Per-feature vectors -> (1, out_pad) f32.
       Padded gamma lanes are ZERO so dead lanes stay exactly 0."""
    packed = {"fcs": [], "out": None}
    n_features = (params["fcs"][0]["w"].shape[1] if params["fcs"]
                  else params["out"]["w"].shape[1])

    def pack_w(w, k_dim, out_pad, tn):
        out_f, in_f = w.shape
        n_tiles = out_pad // tn
        w_p = jnp.zeros((k_dim, out_pad), jnp.bfloat16)
        w_p = w_p.at[:in_f, :out_f].set(w.T.astype(jnp.bfloat16))
        return w_p.reshape(k_dim, n_tiles, tn).transpose(1, 0, 2)

    def pack_vec(v, out_pad):
        return jnp.zeros((1, out_pad), jnp.float32).at[:, :v.shape[0]].set(
            v[None, :].astype(jnp.float32))

    k_dim = n_features
    for layer in params["fcs"]:
        out_f = layer["w"].shape[0]
        out_pad = _round_up(out_f, LANE)
        tn = _pick_tile(out_pad, tn_max)
        packed["fcs"].append({
            "w": pack_w(layer["w"], k_dim, out_pad, tn),
            "b": pack_vec(layer["b"], out_pad),
            "gamma": pack_vec(layer["gamma"], out_pad),   # zero in padded lanes
            "beta": pack_vec(layer["beta"], out_pad),
            "k": k_dim, "out_f": out_f, "out_pad": out_pad,
            "tn": tn, "n_tiles": out_pad // tn,
        })
        k_dim = out_pad

    out_f = params["out"]["w"].shape[0]
    out_pad = _round_up(out_f, LANE)
    tn = _pick_tile(out_pad, tn_max)
    packed["out"] = {
        "w": pack_w(params["out"]["w"], k_dim, out_pad, tn),
        "b": pack_vec(params["out"]["b"], out_pad),
        "k": k_dim, "out_f": out_f, "out_pad": out_pad,
        "tn": tn, "n_tiles": out_pad // tn,
    }
    packed["n_features"] = n_features
    return packed


def make_fcs_block_forward(packed, *, do_bn=True):
    """Build a jitted forward(x) closing over the packed parameters."""
    n_classes = packed["out"]["out_f"]
    out_pad_last = packed["out"]["out_pad"]
    all_layers = list(packed["fcs"]) + [packed["out"]]
    max_k = max(L["k"] for L in all_layers)
    max_tn = max(L["tn"] for L in all_layers)
    hidden_pads = [L["out_pad"] for L in packed["fcs"]]
    max_hidden = max(hidden_pads) if hidden_pads else LANE

    vmem_spec = pl.BlockSpec(memory_space=pltpu.MemorySpace.VMEM)
    hbm_spec = pl.BlockSpec(memory_space=pl.ANY)   # weights stay in HBM, DMA'd per tile

    def fwd(x):
        n = x.shape[0]
        # FCLayer.forward itself skips BN when x.shape[0] == 1, so Linear+bias+ReLU
        # is the exact module semantics for batch size 1.
        apply_bn = do_bn and n > 1

        plan, args, specs = [], [x], [vmem_spec]
        for L in packed["fcs"]:
            kind = "bn_relu" if apply_bn else "bias_relu"
            plan.append({"kind": kind, "k": L["k"], "out_pad": L["out_pad"],
                         "tn": L["tn"], "n_tiles": L["n_tiles"]})
            if apply_bn:
                args += [L["w"], L["gamma"], L["beta"]]
                specs += [hbm_spec, vmem_spec, vmem_spec]
            else:
                args += [L["w"], L["b"]]
                specs += [hbm_spec, vmem_spec]
        Lo = packed["out"]
        plan.append({"kind": "linear", "k": Lo["k"], "out_pad": Lo["out_pad"],
                     "tn": Lo["tn"], "n_tiles": Lo["n_tiles"]})
        args += [Lo["w"], Lo["b"]]
        specs += [hbm_spec, vmem_spec]

        # Cost estimate for XLA scheduling around the custom call.
        flops = 2 * n * sum(L["k"] * L["out_pad"] for L in all_layers)
        bytes_accessed = (sum(int(a.size) * a.dtype.itemsize for a in args)
                          + n * out_pad_last * 4)
        transc = sum(hidden_pads) if apply_bn else 0

        # VMEM budget: weight-tile double buffer + activation ping/pong + VMEM-resident
        # inputs/output, with 2x headroom; capped at 64 MiB so it is valid on v7x.
        scratch_bytes = 2 * max_k * max_tn * 2 + 2 * n * max_hidden * 2
        io_bytes = (int(x.size) * 4 + n * out_pad_last * 4
                    + sum(int(a.size) * 4 for a in args[1:] if a.ndim == 2 and a.shape[0] == 1))
        vmem_limit = int(min(64 * 1024 * 1024,
                             max(8 * 1024 * 1024, 2 * (scratch_bytes + io_bytes))))

        kernel = functools.partial(_fused_fcs_kernel, plan=tuple(plan), n_batch=n)
        y_p = pl.pallas_call(
            kernel,
            out_shape=jax.ShapeDtypeStruct((n, out_pad_last), jnp.float32),
            in_specs=specs,
            out_specs=vmem_spec,
            scratch_shapes=[
                pltpu.VMEM((2, max_k, max_tn), jnp.bfloat16),   # weight-tile double buffer
                pltpu.VMEM((n, max_hidden), jnp.bfloat16),      # activation ping
                pltpu.VMEM((n, max_hidden), jnp.bfloat16),      # activation pong
                pltpu.SemaphoreType.DMA((2,)),
            ],
            compiler_params=pltpu.CompilerParams(vmem_limit_bytes=vmem_limit),
            cost_estimate=pl.CostEstimate(flops=int(flops),
                                          transcendentals=int(transc),
                                          bytes_accessed=int(bytes_accessed)),
        )(*args)
        return y_p[:, :n_classes]

    return jax.jit(fwd)


# --------------------------------------------------------------------------- #
# Pure-JAX reference (true module semantics: bias applied then BN; bf16 matmul
# operands with f32 accumulation to match the kernel's MXU numerics).
# --------------------------------------------------------------------------- #
def _reference_forward(params, x, *, do_bn=True):
    n = x.shape[0]
    h = x
    for layer in params["fcs"]:
        z = jnp.dot(h.astype(jnp.bfloat16), layer["w"].T.astype(jnp.bfloat16),
                    preferred_element_type=jnp.float32) + layer["b"]
        if do_bn and n > 1:
            mean = jnp.mean(z, axis=0, keepdims=True)
            var = jnp.mean((z - mean) ** 2, axis=0, keepdims=True)
            z = (z - mean) * jax.lax.rsqrt(var + BN_EPS) * layer["gamma"] + layer["beta"]
        h = jnp.maximum(z, 0.0)
    z = jnp.dot(h.astype(jnp.bfloat16), params["out"]["w"].T.astype(jnp.bfloat16),
                preferred_element_type=jnp.float32)
    return z + params["out"]["b"]


if __name__ == "__main__":
    key = jax.random.PRNGKey(0)
    k_param, k_x = jax.random.split(key)

    batch = 8
    n_features = 32
    fcs_hidden = [64, 32]
    n_classes = 8

    params = init_fcs_block(k_param, n_features, fcs_hidden, n_classes, bias=True)
    packed = pack_fcs_block(params)
    forward = make_fcs_block_forward(packed, do_bn=True)

    x = jax.random.normal(k_x, (batch, n_features), jnp.float32)

    y = jax.block_until_ready(forward(x))
    y_ref = _reference_forward(params, x, do_bn=True)

    assert y.shape == (batch, n_classes)
    max_err = float(jnp.max(jnp.abs(y - y_ref)))
    assert jnp.allclose(y, y_ref, atol=2e-2, rtol=2e-2), f"mismatch vs reference (max err {max_err})"

    print("KERNEL_OK")
</pallas_src>

<mosaic_0001>
module attributes {stable_mosaic.version = 11 : i64} {
  func.func @_fused_fcs_kernel(%arg0: memref<8x32xf32, #tpu.memory_space<vmem>>, %arg1: memref<1x32x128xbf16, #tpu.memory_space<any>>, %arg2: memref<1x128xf32, #tpu.memory_space<vmem>>, %arg3: memref<1x128xf32, #tpu.memory_space<vmem>>, %arg4: memref<1x128x128xbf16, #tpu.memory_space<any>>, %arg5: memref<1x128xf32, #tpu.memory_space<vmem>>, %arg6: memref<1x128xf32, #tpu.memory_space<vmem>>, %arg7: memref<1x128x128xbf16, #tpu.memory_space<any>>, %arg8: memref<1x128xf32, #tpu.memory_space<vmem>>, %arg9: memref<8x128xf32, #tpu.memory_space<vmem>>, %arg10: memref<2x128x128xbf16, #tpu.memory_space<vmem>>, %arg11: memref<8x128xbf16, #tpu.memory_space<vmem>>, %arg12: memref<8x128xbf16, #tpu.memory_space<vmem>>, %arg13: memref<2x!tpu.dma_semaphore, #tpu.memory_space<semaphore_mem>>) attributes {dimension_semantics = [], scalar_prefetch = 0 : i64, scratch_operands = 4 : i64, tpu.core_type = #tpu.core_type<tc>} {
    %c0_i32 = arith.constant 0 : i32
    %c0_i32_0 = arith.constant 0 : i32
    %c0_i32_1 = arith.constant 0 : i32
    %c0_i32_2 = arith.constant 0 : i32
    %c0_i32_3 = arith.constant 0 : i32
    %0 = tpu.memref_slice %arg1[%c0_i32, %c0_i32_2, %c0_i32_3] : memref<1x32x128xbf16, #tpu.memory_space<any>> -> memref<1x32x128xbf16, #tpu.memory_space<any>>
    %1 = tpu.memref_squeeze %0 : memref<1x32x128xbf16, #tpu.memory_space<any>> -> memref<32x128xbf16, #tpu.memory_space<any>>
    %c0_i32_4 = arith.constant 0 : i32
    %c0_i32_5 = arith.constant 0 : i32
    %2 = tpu.memref_slice %arg10[%c0_i32_0, %c0_i32_4, %c0_i32_5] : memref<2x128x128xbf16, #tpu.memory_space<vmem>> -> memref<1x32x128xbf16, #tpu.memory_space<vmem>>
    %3 = tpu.memref_squeeze %2 : memref<1x32x128xbf16, #tpu.memory_space<vmem>> -> memref<32x128xbf16, #tpu.memory_space<vmem>>
    %4 = tpu.memref_slice %arg13[%c0_i32_1] : memref<2x!tpu.dma_semaphore, #tpu.memory_space<semaphore_mem>> -> memref<1x!tpu.dma_semaphore, #tpu.memory_space<semaphore_mem>>
    %5 = tpu.memref_squeeze %4 : memref<1x!tpu.dma_semaphore, #tpu.memory_space<semaphore_mem>> -> memref<!tpu.dma_semaphore, #tpu.memory_space<semaphore_mem>>
    tpu.enqueue_dma source(%1 : memref<32x128xbf16, #tpu.memory_space<any>>) target(%3 : memref<32x128xbf16, #tpu.memory_space<vmem>>) target_semaphore(%5 : memref<!tpu.dma_semaphore, #tpu.memory_space<semaphore_mem>>)
    %c0 = arith.constant 0 : index
    %c0_6 = arith.constant 0 : index
    %6 = vector.load %arg0[%c0, %c0_6] : memref<8x32xf32, #tpu.memory_space<vmem>>, vector<8x32xf32>
    %7 = arith.truncf %6 : vector<8x32xf32> to vector<8x32xbf16>
    %c0_i32_7 = arith.constant 0 : i32
    %c0_i32_8 = arith.constant 0 : i32
    %c0_i32_9 = arith.constant 0 : i32
    %c0_i32_10 = arith.constant 0 : i32
    %c0_i32_11 = arith.constant 0 : i32
    %8 = tpu.memref_slice %arg1[%c0_i32_7, %c0_i32_10, %c0_i32_11] : memref<1x32x128xbf16, #tpu.memory_space<any>> -> memref<1x32x128xbf16, #tpu.memory_space<any>>
    %9 = tpu.memref_squeeze %8 : memref<1x32x128xbf16, #tpu.memory_space<any>> -> memref<32x128xbf16, #tpu.memory_space<any>>
    %c0_i32_12 = arith.constant 0 : i32
    %c0_i32_13 = arith.constant 0 : i32
    %10 = tpu.memref_slice %arg10[%c0_i32_8, %c0_i32_12, %c0_i32_13] : memref<2x128x128xbf16, #tpu.memory_space<vmem>> -> memref<1x32x128xbf16, #tpu.memory_space<vmem>>
    %11 = tpu.memref_squeeze %10 : memref<1x32x128xbf16, #tpu.memory_space<vmem>> -> memref<32x128xbf16, #tpu.memory_space<vmem>>
    %12 = tpu.memref_slice %arg13[%c0_i32_9] : memref<2x!tpu.dma_semaphore, #tpu.memory_space<semaphore_mem>> -> memref<1x!tpu.dma_semaphore, #tpu.memory_space<semaphore_mem>>
    %13 = tpu.memref_squeeze %12 : memref<1x!tpu.dma_semaphore, #tpu.memory_space<semaphore_mem>> -> memref<!tpu.dma_semaphore, #tpu.memory_space<semaphore_mem>>
    tpu.wait_dma2 semaphore(%13 : memref<!tpu.dma_semaphore, #tpu.memory_space<semaphore_mem>>) src(%9 : memref<32x128xbf16, #tpu.memory_space<any>>) dst(%11 : memref<32x128xbf16, #tpu.memory_space<vmem>>)
    %c0_i32_14 = arith.constant 0 : i32
    %c1_i32 = arith.constant 1 : i32
    %c1_i32_15 = arith.constant 1 : i32
    %c0_i32_16 = arith.constant 0 : i32
    %c0_i32_17 = arith.constant 0 : i32
    %14 = tpu.memref_slice %arg4[%c0_i32_14, %c0_i32_16, %c0_i32_17] : memref<1x128x128xbf16, #tpu.memory_space<any>> -> memref<1x128x128xbf16, #tpu.memory_space<any>>
    %15 = tpu.memref_squeeze %14 : memref<1x128x128xbf16, #tpu.memory_space<any>> -> memref<128x128xbf16, #tpu.memory_space<any>>
    %c0_i32_18 = arith.constant 0 : i32
    %c0_i32_19 = arith.constant 0 : i32
    %16 = tpu.memref_slice %arg10[%c1_i32, %c0_i32_18, %c0_i32_19] : memref<2x128x128xbf16, #tpu.memory_space<vmem>> -> memref<1x128x128xbf16, #tpu.memory_space<vmem>>
    %17 = tpu.memref_squeeze %16 : memref<1x128x128xbf16, #tpu.memory_space<vmem>> -> memref<128x128xbf16, #tpu.memory_space<vmem>>
    %18 = tpu.memref_slice %arg13[%c1_i32_15] : memref<2x!tpu.dma_semaphore, #tpu.memory_space<semaphore_mem>> -> memref<1x!tpu.dma_semaphore, #tpu.memory_space<semaphore_mem>>
    %19 = tpu.memref_squeeze %18 : memref<1x!tpu.dma_semaphore, #tpu.memory_space<semaphore_mem>> -> memref<!tpu.dma_semaphore, #tpu.memory_space<semaphore_mem>>
    tpu.enqueue_dma source(%15 : memref<128x128xbf16, #tpu.memory_space<any>>) target(%17 : memref<128x128xbf16, #tpu.memory_space<vmem>>) target_semaphore(%19 : memref<!tpu.dma_semaphore, #tpu.memory_space<semaphore_mem>>)
    %c0_20 = arith.constant 0 : index
    %c0_21 = arith.constant 0 : index
    %c0_22 = arith.constant 0 : index
    %20 = vector.load %arg10[%c0_20, %c0_21, %c0_22] : memref<2x128x128xbf16, #tpu.memory_space<vmem>>, vector<1x32x128xbf16>
    %21 = vector.shape_cast %20 : vector<1x32x128xbf16> to vector<32x128xbf16>
    %cst = arith.constant dense<0.000000e+00> : vector<8x128xf32>
    %22 = tpu.matmul %7, %21, %cst {dimension_numbers = #tpu.dot_dimension_numbers<[1], [0], [0], [1], [0, 0, 1, 1], [], []>} : vector<8x32xbf16>, vector<32x128xbf16>, vector<8x128xf32> -> vector<8x128xf32>
    %c0_23 = arith.constant 0 : index
    %c0_24 = arith.constant 0 : index
    %23 = vector.load %arg2[%c0_23, %c0_24] : memref<1x128xf32, #tpu.memory_space<vmem>>, vector<1x128xf32>
    %c0_25 = arith.constant 0 : index
    %c0_26 = arith.constant 0 : index
    %24 = vector.load %arg3[%c0_25, %c0_26] : memref<1x128xf32, #tpu.memory_space<vmem>>, vector<1x128xf32>
    %cst_27 = arith.constant dense<0.000000e+00> : vector<128xf32>
    %25 = vector.multi_reduction <add>, %22, %cst_27 [0] : vector<8x128xf32> to vector<128xf32>
    %26 = vector.shape_cast %25 : vector<128xf32> to vector<1x128xf32>
    %cst_28 = arith.constant 1.250000e-01 : f32
    %27 = vector.broadcast %cst_28 : f32 to vector<1x128xf32>
    %28 = arith.mulf %26, %27 : vector<1x128xf32>
    %29 = arith.mulf %22, %22 : vector<8x128xf32>
    %cst_29 = arith.constant dense<0.000000e+00> : vector<128xf32>
    %30 = vector.multi_reduction <add>, %29, %cst_29 [0] : vector<8x128xf32> to vector<128xf32>
    %31 = vector.shape_cast %30 : vector<128xf32> to vector<1x128xf32>
    %cst_30 = arith.constant 1.250000e-01 : f32
    %32 = vector.broadcast %cst_30 : f32 to vector<1x128xf32>
    %33 = arith.mulf %31, %32 : vector<1x128xf32>
    %34 = arith.mulf %28, %28 : vector<1x128xf32>
    %35 = arith.subf %33, %34 : vector<1x128xf32>
    %cst_31 = arith.constant 0.000000e+00 : f32
    %36 = vector.broadcast %cst_31 : f32 to vector<1x128xf32>
    %37 = arith.maximumf %35, %36 : vector<1x128xf32>
    %cst_32 = arith.constant 9.99999974E-6 : f32
    %38 = vector.broadcast %cst_32 : f32 to vector<1x128xf32>
    %39 = arith.addf %37, %38 : vector<1x128xf32>
    %40 = math.rsqrt %39 : vector<1x128xf32>
    %41 = arith.mulf %23, %40 : vector<1x128xf32>
    %42 = arith.mulf %28, %41 : vector<1x128xf32>
    %43 = arith.subf %24, %42 : vector<1x128xf32>
    %44 = vector.broadcast %41 : vector<1x128xf32> to vector<8x128xf32>
    %45 = arith.mulf %22, %44 : vector<8x128xf32>
    %46 = vector.broadcast %43 : vector<1x128xf32> to vector<8x128xf32>
    %47 = arith.addf %45, %46 : vector<8x128xf32>
    %cst_33 = arith.constant 0.000000e+00 : f32
    %48 = vector.broadcast %cst_33 : f32 to vector<8x128xf32>
    %49 = arith.maximumf %47, %48 : vector<8x128xf32>
    %50 = arith.truncf %49 : vector<8x128xf32> to vector<8x128xbf16>
    %c0_34 = arith.constant 0 : index
    %c0_35 = arith.constant 0 : index
    %51 = vector.load %arg11[%c0_34, %c0_35] : memref<8x128xbf16, #tpu.memory_space<vmem>>, vector<8x128xbf16>
    tpu.vector_store %arg11[%c0_34, %c0_35], %50 {strides = array<i32>} : memref<8x128xbf16, #tpu.memory_space<vmem>>, vector<8x128xbf16>,
    %c0_36 = arith.constant 0 : index
    %c0_37 = arith.constant 0 : index
    %52 = vector.load %arg11[%c0_36, %c0_37] : memref<8x128xbf16, #tpu.memory_space<vmem>>, vector<8x128xbf16>
    %c0_i32_38 = arith.constant 0 : i32
    %c1_i32_39 = arith.constant 1 : i32
    %c1_i32_40 = arith.constant 1 : i32
    %c0_i32_41 = arith.constant 0 : i32
    %c0_i32_42 = arith.constant 0 : i32
    %53 = tpu.memref_slice %arg4[%c0_i32_38, %c0_i32_41, %c0_i32_42] : memref<1x128x128xbf16, #tpu.memory_space<any>> -> memref<1x128x128xbf16, #tpu.memory_space<any>>
    %54 = tpu.memref_squeeze %53 : memref<1x128x128xbf16, #tpu.memory_space<any>> -> memref<128x128xbf16, #tpu.memory_space<any>>
    %c0_i32_43 = arith.constant 0 : i32
    %c0_i32_44 = arith.constant 0 : i32
    %55 = tpu.memref_slice %arg10[%c1_i32_39, %c0_i32_43, %c0_i32_44] : memref<2x128x128xbf16, #tpu.memory_space<vmem>> -> memref<1x128x128xbf16, #tpu.memory_space<vmem>>
    %56 = tpu.memref_squeeze %55 : memref<1x128x128xbf16, #tpu.memory_space<vmem>> -> memref<128x128xbf16, #tpu.memory_space<vmem>>
    %57 = tpu.memref_slice %arg13[%c1_i32_40] : memref<2x!tpu.dma_semaphore, #tpu.memory_space<semaphore_mem>> -> memref<1x!tpu.dma_semaphore, #tpu.memory_space<semaphore_mem>>
    %58 = tpu.memref_squeeze %57 : memref<1x!tpu.dma_semaphore, #tpu.memory_space<semaphore_mem>> -> memref<!tpu.dma_semaphore, #tpu.memory_space<semaphore_mem>>
    tpu.wait_dma2 semaphore(%58 : memref<!tpu.dma_semaphore, #tpu.memory_space<semaphore_mem>>) src(%54 : memref<128x128xbf16, #tpu.memory_space<any>>) dst(%56 : memref<128x128xbf16, #tpu.memory_space<vmem>>)
    %c0_i32_45 = arith.constant 0 : i32
    %c0_i32_46 = arith.constant 0 : i32
    %c0_i32_47 = arith.constant 0 : i32
    %c0_i32_48 = arith.constant 0 : i32
    %c0_i32_49 = arith.constant 0 : i32
    %59 = tpu.memref_slice %arg7[%c0_i32_45, %c0_i32_48, %c0_i32_49] : memref<1x128x128xbf16, #tpu.memory_space<any>> -> memref<1x128x128xbf16, #tpu.memory_space<any>>
    %60 = tpu.memref_squeeze %59 : memref<1x128x128xbf16, #tpu.memory_space<any>> -> memref<128x128xbf16, #tpu.memory_space<any>>
    %c0_i32_50 = arith.constant 0 : i32
    %c0_i32_51 = arith.constant 0 : i32
    %61 = tpu.memref_slice %arg10[%c0_i32_46, %c0_i32_50, %c0_i32_51] : memref<2x128x128xbf16, #tpu.memory_space<vmem>> -> memref<1x128x128xbf16, #tpu.memory_space<vmem>>
    %62 = tpu.memref_squeeze %61 : memref<1x128x128xbf16, #tpu.memory_space<vmem>> -> memref<128x128xbf16, #tpu.memory_space<vmem>>
    %63 = tpu.memref_slice %arg13[%c0_i32_47] : memref<2x!tpu.dma_semaphore, #tpu.memory_space<semaphore_mem>> -> memref<1x!tpu.dma_semaphore, #tpu.memory_space<semaphore_mem>>
    %64 = tpu.memref_squeeze %63 : memref<1x!tpu.dma_semaphore, #tpu.memory_space<semaphore_mem>> -> memref<!tpu.dma_semaphore, #tpu.memory_space<semaphore_mem>>
    tpu.enqueue_dma source(%60 : memref<128x128xbf16, #tpu.memory_space<any>>) target(%62 : memref<128x128xbf16, #tpu.memory_space<vmem>>) target_semaphore(%64 : memref<!tpu.dma_semaphore, #tpu.memory_space<semaphore_mem>>)
    %c1 = arith.constant 1 : index
    %c0_52 = arith.constant 0 : index
    %c0_53 = arith.constant 0 : index
    %65 = vector.load %arg10[%c1, %c0_52, %c0_53] : memref<2x128x128xbf16, #tpu.memory_space<vmem>>, vector<1x128x128xbf16>
    %66 = vector.shape_cast %65 : vector<1x128x128xbf16> to vector<128x128xbf16>
    %cst_54 = arith.constant dense<0.000000e+00> : vector<8x128xf32>
    %67 = tpu.matmul %52, %66, %cst_54 {dimension_numbers = #tpu.dot_dimension_numbers<[1], [0], [0], [1], [0, 0, 1, 1], [], []>} : vector<8x128xbf16>, vector<128x128xbf16>, vector<8x128xf32> -> vector<8x128xf32>
    %c0_55 = arith.constant 0 : index
    %c0_56 = arith.constant 0 : index
    %68 = vector.load %arg5[%c0_55, %c0_56] : memref<1x128xf32, #tpu.memory_space<vmem>>, vector<1x128xf32>
    %c0_57 = arith.constant 0 : index
    %c0_58 = arith.constant 0 : index
    %69 = vector.load %arg6[%c0_57, %c0_58] : memref<1x128xf32, #tpu.memory_space<vmem>>, vector<1x128xf32>
    %cst_59 = arith.constant dense<0.000000e+00> : vector<128xf32>
    %70 = vector.multi_reduction <add>, %67, %cst_59 [0] : vector<8x128xf32> to vector<128xf32>
    %71 = vector.shape_cast %70 : vector<128xf32> to vector<1x128xf32>
    %cst_60 = arith.constant 1.250000e-01 : f32
    %72 = vector.broadcast %cst_60 : f32 to vector<1x128xf32>
    %73 = arith.mulf %71, %72 : vector<1x128xf32>
    %74 = arith.mulf %67, %67 : vector<8x128xf32>
    %cst_61 = arith.constant dense<0.000000e+00> : vector<128xf32>
    %75 = vector.multi_reduction <add>, %74, %cst_61 [0] : vector<8x128xf32> to vector<128xf32>
    %76 = vector.shape_cast %75 : vector<128xf32> to vector<1x128xf32>
    %cst_62 = arith.constant 1.250000e-01 : f32
    %77 = vector.broadcast %cst_62 : f32 to vector<1x128xf32>
    %78 = arith.mulf %76, %77 : vector<1x128xf32>
    %79 = arith.mulf %73, %73 : vector<1x128xf32>
    %80 = arith.subf %78, %79 : vector<1x128xf32>
    %cst_63 = arith.constant 0.000000e+00 : f32
    %81 = vector.broadcast %cst_63 : f32 to vector<1x128xf32>
    %82 = arith.maximumf %80, %81 : vector<1x128xf32>
    %cst_64 = arith.constant 9.99999974E-6 : f32
    %83 = vector.broadcast %cst_64 : f32 to vector<1x128xf32>
    %84 = arith.addf %82, %83 : vector<1x128xf32>
    %85 = math.rsqrt %84 : vector<1x128xf32>
    %86 = arith.mulf %68, %85 : vector<1x128xf32>
    %87 = arith.mulf %73, %86 : vector<1x128xf32>
    %88 = arith.subf %69, %87 : vector<1x128xf32>
    %89 = vector.broadcast %86 : vector<1x128xf32> to vector<8x128xf32>
    %90 = arith.mulf %67, %89 : vector<8x128xf32>
    %91 = vector.broadcast %88 : vector<1x128xf32> to vector<8x128xf32>
    %92 = arith.addf %90, %91 : vector<8x128xf32>
    %cst_65 = arith.constant 0.000000e+00 : f32
    %93 = vector.broadcast %cst_65 : f32 to vector<8x128xf32>
    %94 = arith.maximumf %92, %93 : vector<8x128xf32>
    %95 = arith.truncf %94 : vector<8x128xf32> to vector<8x128xbf16>
    %c0_66 = arith.constant 0 : index
    %c0_67 = arith.constant 0 : index
    %96 = vector.load %arg12[%c0_66, %c0_67] : memref<8x128xbf16, #tpu.memory_space<vmem>>, vector<8x128xbf16>
    tpu.vector_store %arg12[%c0_66, %c0_67], %95 {strides = array<i32>} : memref<8x128xbf16, #tpu.memory_space<vmem>>, vector<8x128xbf16>,
    %c0_68 = arith.constant 0 : index
    %c0_69 = arith.constant 0 : index
    %97 = vector.load %arg12[%c0_68, %c0_69] : memref<8x128xbf16, #tpu.memory_space<vmem>>, vector<8x128xbf16>
    %c0_i32_70 = arith.constant 0 : i32
    %c0_i32_71 = arith.constant 0 : i32
    %c0_i32_72 = arith.constant 0 : i32
    %c0_i32_73 = arith.constant 0 : i32
    %c0_i32_74 = arith.constant 0 : i32
    %98 = tpu.memref_slice %arg7[%c0_i32_70, %c0_i32_73, %c0_i32_74] : memref<1x128x128xbf16, #tpu.memory_space<any>> -> memref<1x128x128xbf16, #tpu.memory_space<any>>
    %99 = tpu.memref_squeeze %98 : memref<1x128x128xbf16, #tpu.memory_space<any>> -> memref<128x128xbf16, #tpu.memory_space<any>>
    %c0_i32_75 = arith.constant 0 : i32
    %c0_i32_76 = arith.constant 0 : i32
    %100 = tpu.memref_slice %arg10[%c0_i32_71, %c0_i32_75, %c0_i32_76] : memref<2x128x128xbf16, #tpu.memory_space<vmem>> -> memref<1x128x128xbf16, #tpu.memory_space<vmem>>
    %101 = tpu.memref_squeeze %100 : memref<1x128x128xbf16, #tpu.memory_space<vmem>> -> memref<128x128xbf16, #tpu.memory_space<vmem>>
    %102 = tpu.memref_slice %arg13[%c0_i32_72] : memref<2x!tpu.dma_semaphore, #tpu.memory_space<semaphore_mem>> -> memref<1x!tpu.dma_semaphore, #tpu.memory_space<semaphore_mem>>
    %103 = tpu.memref_squeeze %102 : memref<1x!tpu.dma_semaphore, #tpu.memory_space<semaphore_mem>> -> memref<!tpu.dma_semaphore, #tpu.memory_space<semaphore_mem>>
    tpu.wait_dma2 semaphore(%103 : memref<!tpu.dma_semaphore, #tpu.memory_space<semaphore_mem>>) src(%99 : memref<128x128xbf16, #tpu.memory_space<any>>) dst(%101 : memref<128x128xbf16, #tpu.memory_space<vmem>>)
    %c0_77 = arith.constant 0 : index
    %c0_78 = arith.constant 0 : index
    %c0_79 = arith.constant 0 : index
    %104 = vector.load %arg10[%c0_77, %c0_78, %c0_79] : memref<2x128x128xbf16, #tpu.memory_space<vmem>>, vector<1x128x128xbf16>
    %105 = vector.shape_cast %104 : vector<1x128x128xbf16> to vector<128x128xbf16>
    %cst_80 = arith.constant dense<0.000000e+00> : vector<8x128xf32>
    %106 = tpu.matmul %97, %105, %cst_80 {dimension_numbers = #tpu.dot_dimension_numbers<[1], [0], [0], [1], [0, 0, 1, 1], [], []>} : vector<8x128xbf16>, vector<128x128xbf16>, vector<8x128xf32> -> vector<8x128xf32>
    %c0_81 = arith.constant 0 : index
    %c0_82 = arith.constant 0 : index
    %107 = vector.load %arg8[%c0_81, %c0_82] : memref<1x128xf32, #tpu.memory_space<vmem>>, vector<1x128xf32>
    %108 = vector.broadcast %107 : vector<1x128xf32> to vector<8x128xf32>
    %109 = arith.addf %106, %108 : vector<8x128xf32>
    %c0_83 = arith.constant 0 : index
    %c0_84 = arith.constant 0 : index
    %110 = vector.load %arg9[%c0_83, %c0_84] : memref<8x128xf32, #tpu.memory_space<vmem>>, vector<8x128xf32>
    tpu.vector_store %arg9[%c0_83, %c0_84], %109 {strides = array<i32>} : memref<8x128xf32, #tpu.memory_space<vmem>>, vector<8x128xf32>,
    return
  }
}

</mosaic_0001>

<bundles_post_ra>
// kernel: fwd.1
= control target key start
LH: loop header
LB: loop body
LE: loop exit
PB: predicated region body
PF: predicated region fallthrough
CT: control target
= control target key end

     0   :  { %14 = vsyncpa [#allocation7], 0  ;;  %s845_s0 = inlined_call_operand.hbm [shape: f32[8,32], index: 0, kind: input, shape index: {}]   ;;  %s846_s1 = inlined_call_operand.hbm [shape: bf16[1,32,128], index: 1, kind: input, shape index: {}]   ;;  %s847_s2 = inlined_call_operand.vmem [shape: f32[1,128], index: 2, kind: input, shape index: {}]   ;;  %s848_s3 = inlined_call_operand.vmem [shape: f32[1,128], index: 3, kind: input, shape index: {}, may-alias: {3,6}]   ;;  %s849_s4 = inlined_call_operand.hbm [shape: bf16[1,128,128], index: 4, kind: input, shape index: {}]   ;;  %s850_s5 = inlined_call_operand.vmem [shape: f32[1,128], index: 5, kind: input, shape index: {}]   ;;  %s851_s6 = inlined_call_operand.vmem [shape: f32[1,128], index: 6, kind: input, shape index: {}, may-alias: {3,6}]   ;;  %s852_s7 = inlined_call_operand.hbm [shape: bf16[1,128,128], index: 7, kind: input, shape index: {}]   ;;  %s853_s8 = inlined_call_operand.vmem [shape: f32[1,128], index: 8, kind: input, shape index: {}]   ;;  %s854_s9 = inlined_call_operand.hbm [shape: f32[8,128], index: 9, kind: output, shape index: {}]  }
   0x1   :  { %15 = vsyncpa [#allocation8], 0  ;;  %s706_s30 = smov [#allocation6]  }
   0x2   :  { %s22_s10 = sshll.u32 %s706_s30, 4  ;;  %s23_s10 = int_to_ptr.vmem [resolvable:$true] %s22_s10 }
   0x3   :  { %s604_s11 = scalar_lea.vmem %s23_s10, 128  ;;  %p609_p1 = scmp.lt.s32.totalorder %s23_s10, %s23_s10 }
   0x4   :  { %p605_p0 = scmp.ne.s32.totalorder %s23_s10, %s604_s11  ;;  %p610_p2 = scmp.lt.s32.totalorder %s604_s11, %s604_s11 }
   0x6   :  { %p611_p3 = por %p610_p2, %p609_p1 }
   0x8   :  { %p612_p4 = pnand %p611_p3, %p605_p0 }
   0xa   :  { %615 = shalt.err (!%p612_p4)
}
   0xb   :  { %25 = dma.hbm_to_vmem [thread:$0]  %s845_s0, 128, %s23_s10, [#allocation7]  }
   0xc   :  { %696 = dma.done.wait [#allocation7], 128  }
   0xd   :  { %697 = vsyncadd [#allocation7], 4294967168  ;;  %s707_s14 = smov [#allocation2]  }
   0xe   :  { %s47_s15 = sshll.u32 %s707_s14, 4  ;;  %s765_s15 = int_to_ptr.vmem [resolvable:$true] %s47_s15 }
   0xf   :  { %s624_s16 = scalar_lea.vmem %s765_s15, 256  ;;  %s770_s17 = scalar_lea.vmem %s765_s15, 2048 }
  0x10   :  { %p625_p5 = scmp.ne.s32.totalorder %s765_s15, %s624_s16  ;;  %p629_p6 = scmp.lt.s32.totalorder %s765_s15, %s765_s15 }
  0x11   :  { %p630_p7 = scmp.lt.s32.totalorder %s770_s17, %s624_s16 }
  0x13   :  { %p631_p8 = por %p630_p7, %p629_p6 }
  0x15   :  { %p632_p9 = pnand %p631_p8, %p625_p5 }
  0x17   :  { %635 = shalt.err (!%p632_p9)  }
  0x18   :  { %50 = dma.hbm_to_vmem [thread:$0]  %s846_s1, 256, %s765_s15, [#allocation5]  ;;  %v51_v0 = vld [vmem:[#allocation6] sm:$0xff] }
  0x19   :  { %v52_v1 = vpack.c.bf16 %v51_v0, %v51_v0 }
  0x1a   :  { %698 = dma.done.wait [#allocation5], 256 }
  0x1b   :  { %699 = vsyncadd [#allocation5], 4294967040  ;;  %s708_s19 = smov [#allocation2 + $0x40]   ;;  %v709_v2 = vmov 0.0   ;;  %vm710_vm0 = vmmov 0  }
  0x1c   :  { %s66_s20 = sshll.u32 %s708_s19, 4  ;;  %520 = vmatprep.subr.bf16.mxu0 %v709_v2  ;;  %524 = vmatprep.mubr.msk.bf16.mxu0 %vm710_vm0, %v709_v2  ;;  %s67_s20 = int_to_ptr.vmem [resolvable:$true] %s66_s20 }
  0x1d   :  { %s644_s21 = scalar_lea.vmem %s67_s20, 1024  ;;  %p649_p11 = scmp.lt.s32.totalorder %s67_s20, %s765_s15 }
  0x1e   :  { %p645_p10 = scmp.ne.s32.totalorder %s67_s20, %s644_s21  ;;  %p650_p12 = scmp.lt.s32.totalorder %s770_s17, %s644_s21 }
  0x20   :  { %p651_p13 = por %p650_p12, %p649_p11 }
  0x22   :  { %p652_p0 = pnand %p651_p13, %p645_p10 }
  0x24   :  { %655 = shalt.err (!%p652_p0)  }
  0x25   :  { %69 = dma.hbm_to_vmem [thread:$0]  %s849_s4, 1024, %s67_s20, [#allocation5 + $0x1]  ;;  %vm86_vm1 = vcmask 261120   ;;  %v156_v28 = vlaneseq  ;;  %v130_v30 = vld [vmem:[%s847_s2] sm:$0x1] }
  0x26   :  { %v574_v3 = vld [vmem:[#allocation2 + $0x8] sm:$0xff]   ;;  %v575_v4 = vld [vmem:[#allocation2] sm:$0xff]  }
  0x27   :  { %521 = vmatpush3.bf16.msra.mxu0 %v574_v3  ;;  %v157_v29 = vshrl.u32 %v156_v28, 7  ;;  %v131_v34 = vld [vmem:[%s848_s3] sm:$0x1] }
  0x28   :  { %522 = vmatprep.subr.bf16.mxu0 %v709_v2 }
  0x29   :  { %v794_v31 = vsub.s32 0, %v157_v29 }
  0x2b   :  { %523 = vmatpush3.bf16.msra.mxu0 %v575_v4 }
  0x2e   :  { %525 = vmatmul.mubr.msk.bf16.vlgmr.msra.gmra.mxu0 %vm86_vm1, %v52_v1 }
  0xee   :  { %v124_v5 = vpop.f32.mrf.mxu0 }
  0xef   :  { %v132_v6 = vrot.slane %v124_v5, 4  ;;  %v139_v7 = vmul.f32 %v124_v5, %v124_v5 }
  0xf0   :  { %v526_v8 = vpop.f32.mrf.mxu0 }
  0xf1   :  { %v133_v9 = vadd.f32 %v132_v6, %v124_v5  ;;  %v140_v10 = vrot.slane %v139_v7, 4 }
  0xf2   :  { %v127_v11 = vpop.f32.mrf.mxu0 }
  0xf3   :  { %v134_v12 = vrot.slane %v133_v9, 2  ;;  %v141_v13 = vadd.f32 %v140_v10, %v139_v7 }
  0xf4   :  { %v527_v14 = vpop.f32.mrf.mxu0 }
  0xf5   :  { %v135_v15 = vadd.f32 %v134_v12, %v133_v9  ;;  %v142_v16 = vrot.slane %v141_v13, 2 }
  0xf7   :  { %v136_v17 = vrot.slane %v135_v15, 1  ;;  %v143_v18 = vadd.f32 %v142_v16, %v141_v13 }
  0xf9   :  { %v137_v19 = vadd.f32 %v136_v17, %v135_v15  ;;  %v144_v20 = vrot.slane %v143_v18, 1 }
  0xfb   :  { %v138_v21 = vmul.f32 0.125, %v137_v19  ;;  %v145_v22 = vadd.f32 %v144_v20, %v143_v18 }
  0xfd   :  { %v146_v23 = vmul.f32 0.125, %v145_v22  ;;  %v147_v24 = vmul.f32 %v138_v21, %v138_v21 }
  0xff   :  { %v148_v25 = vsub.f32 %v146_v23, %v147_v24 }
 0x101   :  { %v149_v26 = vmax.f32 %v148_v25, 0.0 }
 0x103   :  { %v150_v27 = vadd.f32 1e-05, %v149_v26 }
 0x105   :  { %576 = vrsqrt.f32 %v150_v27 }
 0x112   :  { %v577_v32 = vpop.eup %576 }
 0x113   :  { %v152_v33 = vmul.f32 %v577_v32, %v130_v30 }
 0x115   :  { %v153_v35 = vmul.f32 %v152_v33, %v138_v21  ;;  %v159_v36 = vrot.slane %v152_v33, %v794_v31 }
 0x117   :  { %v154_v37 = vsub.f32 %v131_v34, %v153_v35  ;;  %v161_v38 = vmul.f32 %v159_v36, %v124_v5 }
 0x119   :  { %v166_v39 = vrot.slane %v154_v37, %v794_v31 }
 0x11b   :  { %v168_v40 = vadd.f32 %v166_v39, %v161_v38 }
 0x11d   :  { %v169_v41 = vmax.f32 %v168_v40, 0.0 }
 0x11f   :  { %v170_v42 = vpack.c.bf16 %v169_v41, %v169_v41 }
 0x121   :  { %171 = vst [vmem:[#allocation3] sm:$0xf] %v170_v42 }
 0x128   :  { %v172_v43 = vld [vmem:[#allocation3] sm:$0xf] }
 0x129   :  { %700 = dma.done.wait [#allocation5 + $0x1], 1024 }
 0x12a   :  { %701 = vsyncadd [#allocation5 + $0x1], 4294966272  ;;  %528 = vmatprep.subr.bf16.mxu1 %v709_v2  ;;  %544 = vmatprep.mubr.msk.bf16.mxu1 %vm710_vm0, %v709_v2  ;;  %s664_s2 = scalar_lea.vmem %s765_s15, 1024 }
 0x12b   :  { %p665_p1 = scmp.ne.s32.totalorder %s765_s15, %s664_s2  ;;  %p670_p2 = scmp.lt.s32.totalorder %s770_s17, %s664_s2 }
 0x12d   :  { %p671_p3 = por %p670_p2, %p629_p6 }
 0x12f   :  { %p672_p4 = pnand %p671_p3, %p665_p1 }
 0x131   :  { %675 = shalt.err (!%p672_p4)  }
 0x132   :  { %187 = dma.hbm_to_vmem [thread:$0]  %s852_s7, 1024, %s765_s15, [#allocation5]  ;;  %v292_v12 = vld [vmem:[%s850_s5] sm:$0x1] }
 0x133   :  { %v578_v44 = vld [vmem:[#allocation2 + $0x78] sm:$0xff]   ;;  %v579_v45 = vld [vmem:[#allocation2 + $0x70] sm:$0xff]   ;;  %v580_v46 = vld [vmem:[#allocation2 + $0x68] sm:$0xff]  }
 0x134   :  { %529 = vmatpush3.bf16.msra.mxu1 %v578_v44  ;;  %v581_v47 = vld [vmem:[#allocation2 + $0x60] sm:$0xff]   ;;  %v582_v48 = vld [vmem:[#allocation2 + $0x58] sm:$0xff]   ;;  %v583_v49 = vld [vmem:[#allocation2 + $0x50] sm:$0xff]  }
 0x135   :  { %530 = vmatprep.subr.bf16.mxu1 %v709_v2  ;;  %v584_v50 = vld [vmem:[#allocation2 + $0x48] sm:$0xff]   ;;  %v585_v51 = vld [vmem:[#allocation2 + $0x40] sm:$0xff]  }
 0x136   :  { %v293_v15 = vld [vmem:[%s851_s6] sm:$0x1] }
 0x138   :  { %531 = vmatpush3.bf16.msra.mxu1 %v579_v45 }
 0x139   :  { %532 = vmatprep.subr.bf16.mxu1 %v709_v2 }
 0x13c   :  { %533 = vmatpush3.bf16.msra.mxu1 %v580_v46 }
 0x13d   :  { %534 = vmatprep.subr.bf16.mxu1 %v709_v2 }
 0x140   :  { %535 = vmatpush3.bf16.msra.mxu1 %v581_v47 }
 0x141   :  { %536 = vmatprep.subr.bf16.mxu1 %v709_v2 }
 0x144   :  { %537 = vmatpush3.bf16.msra.mxu1 %v582_v48 }
 0x145   :  { %538 = vmatprep.subr.bf16.mxu1 %v709_v2 }
 0x148   :  { %539 = vmatpush3.bf16.msra.mxu1 %v583_v49 }
 0x149   :  { %540 = vmatprep.subr.bf16.mxu1 %v709_v2 }
 0x14c   :  { %541 = vmatpush3.bf16.msra.mxu1 %v584_v50 }
 0x14d   :  { %542 = vmatprep.subr.bf16.mxu1 %v709_v2 }
 0x150   :  { %543 = vmatpush3.bf16.msra.mxu1 %v585_v51 }
 0x153   :  { %545 = vmatmul.mubr.bf16.vlgmr.msra.gmra.mxu1 %v172_v43 }
 0x213   :  { %v286_v52 = vpop.f32.mrf.mxu1 }
 0x214   :  { %v294_v53 = vrot.slane %v286_v52, 4  ;;  %v301_v54 = vmul.f32 %v286_v52, %v286_v52 }
 0x215   :  { %v546_v55 = vpop.f32.mrf.mxu1 }
 0x216   :  { %v295_v56 = vadd.f32 %v294_v53, %v286_v52  ;;  %v302_v57 = vrot.slane %v301_v54, 4 }
 0x217   :  { %v289_v58 = vpop.f32.mrf.mxu1 }
 0x218   :  { %v296_v59 = vrot.slane %v295_v56, 2  ;;  %v303_v60 = vadd.f32 %v302_v57, %v301_v54 }
 0x219   :  { %v547_v61 = vpop.f32.mrf.mxu1 }
 0x21a   :  { %v297_v62 = vadd.f32 %v296_v59, %v295_v56  ;;  %v304_v63 = vrot.slane %v303_v60, 2 }
 0x21c   :  { %v298_v0 = vrot.slane %v297_v62, 1  ;;  %v305_v1 = vadd.f32 %v304_v63, %v303_v60 }
 0x21e   :  { %v299_v3 = vadd.f32 %v298_v0, %v297_v62  ;;  %v306_v4 = vrot.slane %v305_v1, 1 }
 0x220   :  { %v300_v5 = vmul.f32 0.125, %v299_v3  ;;  %v307_v6 = vadd.f32 %v306_v4, %v305_v1 }
 0x222   :  { %v308_v7 = vmul.f32 0.125, %v307_v6  ;;  %v309_v8 = vmul.f32 %v300_v5, %v300_v5 }
 0x224   :  { %v310_v9 = vsub.f32 %v308_v7, %v309_v8 }
 0x226   :  { %v311_v10 = vmax.f32 %v310_v9, 0.0 }
 0x228   :  { %v312_v11 = vadd.f32 1e-05, %v311_v10 }
 0x22a   :  { %586 = vrsqrt.f32 %v312_v11 }
 0x237   :  { %v587_v13 = vpop.eup %586 }
 0x238   :  { %v314_v14 = vmul.f32 %v587_v13, %v292_v12 }
 0x23a   :  { %v315_v16 = vmul.f32 %v314_v14, %v300_v5  ;;  %v321_v17 = vrot.slane %v314_v14, %v794_v31 }
 0x23c   :  { %v316_v18 = vsub.f32 %v293_v15, %v315_v16  ;;  %v323_v19 = vmul.f32 %v321_v17, %v286_v52 }
 0x23e   :  { %v328_v20 = vrot.slane %v316_v18, %v794_v31 }
 0x240   :  { %v330_v21 = vadd.f32 %v328_v20, %v323_v19 }
 0x242   :  { %v331_v22 = vmax.f32 %v330_v21, 0.0 }
 0x244   :  { %v332_v23 = vpack.c.bf16 %v331_v22, %v331_v22 }
 0x246   :  { %333 = vst [vmem:[#allocation4] sm:$0xf] %v332_v23 }
 0x24d   :  { %v334_v24 = vld [vmem:[#allocation4] sm:$0xf] }
 0x24e   :  { %702 = dma.done.wait [#allocation5], 1024 }
 0x24f   :  { %703 = vsyncadd [#allocation5], 4294966272  ;;  %548 = vmatprep.subr.bf16.mxu0 %v709_v2  ;;  %564 = vmatprep.mubr.msk.bf16.mxu0 %vm710_vm0, %v709_v2  ;;  %v588_v25 = vld [vmem:[#allocation2 + $0x38] sm:$0xff]   ;;  %v589_v26 = vld [vmem:[#allocation2 + $0x30] sm:$0xff]   ;;  %s711_s30 = smov [#allocation9]  }
 0x250   :  { %549 = vmatpush3.bf16.msra.mxu0 %v588_v25  ;;  %v590_v27 = vld [vmem:[#allocation2 + $0x28] sm:$0xff]   ;;  %v591_v28 = vld [vmem:[#allocation2 + $0x20] sm:$0xff]   ;;  %v592_v29 = vld [vmem:[#allocation2 + $0x18] sm:$0xff]   ;;  %s455_s10 = sshll.u32 %s711_s30, 4  ;;  %s456_s10 = int_to_ptr.vmem [resolvable:$true] %s455_s10 }
 0x251   :  { %550 = vmatprep.subr.bf16.mxu0 %v709_v2  ;;  %v593_v30 = vld [vmem:[#allocation2 + $0x10] sm:$0xff]   ;;  %v594_v31 = vld [vmem:[#allocation2 + $0x8] sm:$0xff]   ;;  %v595_v32 = vld [vmem:[#allocation2] sm:$0xff]   ;;  %s676_s11 = scalar_lea.vmem %s456_s10, 128  ;;  %p681_p6 = scmp.lt.s32.totalorder %s456_s10, %s456_s10 }
 0x252   :  { %v488_v33 = vld [vmem:[%s853_s8] ss:$0 sm:$0xff]  ;;  %p677_p5 = scmp.ne.s32.totalorder %s456_s10, %s676_s11  ;;  %p682_p7 = scmp.lt.s32.totalorder %s676_s11, %s676_s11 }
 0x254   :  { %551 = vmatpush3.bf16.msra.mxu0 %v589_v26  ;;  %p683_p8 = por %p682_p7, %p681_p6 }
 0x255   :  { %552 = vmatprep.subr.bf16.mxu0 %v709_v2 }
 0x256   :  { %p684_p9 = pnand %p683_p8, %p677_p5 }
 0x258   :  { %553 = vmatpush3.bf16.msra.mxu0 %v590_v27 }
 0x259   :  { %554 = vmatprep.subr.bf16.mxu0 %v709_v2 }
 0x25c   :  { %555 = vmatpush3.bf16.msra.mxu0 %v591_v28 }
 0x25d   :  { %556 = vmatprep.subr.bf16.mxu0 %v709_v2 }
 0x260   :  { %557 = vmatpush3.bf16.msra.mxu0 %v592_v29 }
 0x261   :  { %558 = vmatprep.subr.bf16.mxu0 %v709_v2 }
 0x264   :  { %559 = vmatpush3.bf16.msra.mxu0 %v593_v30 }
 0x265   :  { %560 = vmatprep.subr.bf16.mxu0 %v709_v2 }
 0x268   :  { %561 = vmatpush3.bf16.msra.mxu0 %v594_v31 }
 0x269   :  { %562 = vmatprep.subr.bf16.mxu0 %v709_v2 }
 0x26c   :  { %563 = vmatpush3.bf16.msra.mxu0 %v595_v32 }
 0x26f   :  { %565 = vmatmul.mubr.bf16.vlgmr.msra.gmra.mxu0 %v334_v24 }
 0x32f   :  { %v442_v34 = vpop.f32.mrf.mxu0 }
 0x330   :  { %v443_v35 = vadd.f32 %v488_v33, %v442_v34 }
 0x331   :  { %v566_v36 = vpop.f32.mrf.mxu0 }
 0x332   :  { %448 = vst [vmem:[#allocation9] sm:$0xff] %v443_v35 }
 0x333   :  { %v445_v37 = vpop.f32.mrf.mxu0 }
 0x334   :  { %687 = shalt.err (!%p684_p9)
}
 0x335   :  { %458 = dma.vmem_to_hbm [thread:$0]  %s456_s10, 128, %s854_s9, [#allocation8]   ;;  %v567_v2 = vpop.f32.mrf.mxu0 }
 0x336   :  { %704 = dma.done.wait [#allocation8], 128  }
 0x337   :  { %705 = vsyncadd [#allocation8], 4294967168 }
 0x338   :  { %462 = vsyncpa [#allocation7], 1 }
 0x339   :  { %463 = vsyncpa [#allocation8], 1 }
 0x33a   :  { %464 = vsyncmov [#allocation5] }
 0x33d   :  { %s465_s8 = vpop.sfrf %464 }
 0x33e   :  { %p497_p10 = scmp.ne.s32.totalorder %s465_s8, 0 }
 0x340   :  { %469 = shalt.err (%p497_p10)  }
 0x341   :  { %471 = vsyncmov [#allocation5 + $0x1] }
 0x344   :  { %s472_s14 = vpop.sfrf %471 }
 0x345   :  { %p498_p11 = scmp.ne.s32.totalorder %s472_s14, 0 }
 0x347   :  { %476 = shalt.err (%p498_p11)  }

</bundles_post_ra>
